<compile_context>
chip_gen: v7x
topology: tpu7x:2x2x1
jax: 0.10.0
libtpu: 0.0.40
codegen_flags: <defaults>
</compile_context>

<pallas_src>
import functools

import numpy as np
import jax
import jax.numpy as jnp
from jax.experimental import pallas as pl
from jax.experimental.pallas import tpu as pltpu


def _nms_kernel(boxes_ref, boxes_t_ref, keep_ref, sup_ref, *, iou_thresh, n_real):
    """Greedy NMS over score-sorted (zero-padded) boxes.

    boxes_ref   : (Np, 4)  f32  score-sorted boxes (x1, y1, x2, y2), zero pad past n_real
    boxes_t_ref : (4, Np)  f32  same boxes, transposed (lane-dense coordinate rows)
    keep_ref    : (1, Np)  f32  output keep mask (1.0 = kept)
    sup_ref     : (Np, Np) f32  VMEM scratch; sup[i, j] = 1.0 iff box i suppresses box j
    """
    b = boxes_ref[...]          # (Np, 4)
    bt = boxes_t_ref[...]       # (4, Np)
    Np = b.shape[0]

    x1c, y1c, x2c, y2c = b[:, 0:1], b[:, 1:2], b[:, 2:3], b[:, 3:4]        # (Np, 1)
    x1r, y1r, x2r, y2r = bt[0:1, :], bt[1:2, :], bt[2:3, :], bt[3:4, :]    # (1, Np)

    area_c = (x2c - x1c) * (y2c - y1c)        # (Np, 1)
    area_r = (x2r - x1r) * (y2r - y1r)        # (1, Np)

    inter = (jnp.maximum(jnp.minimum(x2c, x2r) - jnp.maximum(x1c, x1r), 0.0)
             * jnp.maximum(jnp.minimum(y2c, y2r) - jnp.maximum(y1c, y1r), 0.0))
    union = area_c + area_r - inter           # (Np, Np)

    row_idx = jax.lax.broadcasted_iota(jnp.int32, (Np, Np), 0)
    col_idx = jax.lax.broadcasted_iota(jnp.int32, (Np, Np), 1)

    # Division-free IoU test (iou > t  <=>  inter > t*union for union >= 0);
    # NaN-free for degenerate/zero-area boxes. Triangular mask fused in
    # (column j can only be suppressed by a strictly higher-scored row i).
    sup = (inter > jnp.float32(iou_thresh) * union) & (col_idx > row_idx)
    sup_ref[...] = jnp.where(sup, 1.0, 0.0)   # precomputed once, row-sliced in the loop

    # Hoisted out of the loop (JAX does not CSE broadcast_in_dim).
    col_1d = jax.lax.broadcasted_iota(jnp.int32, (1, Np), 1)

    def body(i, keep):
        # keep: (1, Np) f32 in {0,1}; 1.0 means the box is still kept.
        # keep[i] as a (1, 1) value via a single-vreg masked lane reduce
        # (portable alternative to a dynamic lane slice).
        keep_i = jnp.sum(jnp.where(col_1d == i, keep, 0.0), axis=1, keepdims=True)
        # Row i of the precomputed suppression matrix: one dynamic sublane slice.
        row_i = sup_ref[pl.ds(i, 1), :]                                    # (1, Np)
        # Multiplicative {0,1} update: zero every j suppressed by a still-kept i.
        return keep * (1.0 - keep_i * row_i)

    unroll = True if n_real <= 64 else 8
    keep = jax.lax.fori_loop(0, n_real, body, jnp.ones((1, Np), jnp.float32),
                             unroll=unroll)
    keep_ref[...] = keep


def nms_pallas(rois, scores, iou_threshold):
    """torchvision.ops.nms semantics; IoU build + greedy suppression in Pallas.

    Returns (kept_indices, num_kept): kept_indices has static shape (N,),
    filled with kept-box indices in decreasing-score order, padded with -1.
    """
    N = rois.shape[0]
    Np = ((N + 127) // 128) * 128            # lane-dense padding (multiple of 128)

    order = jnp.argsort(-scores)             # decreasing score
    boxes_sorted = rois[order].astype(jnp.float32)
    # Zero-area pad boxes: inter == 0 with everything, so they never suppress
    # and never get suppressed; they are sliced off after the kernel.
    boxes_padded = jnp.zeros((Np, 4), jnp.float32).at[:N].set(boxes_sorted)

    # NOTE: for very large N the sup build should be column-blocked over a
    # parallel grid axis (and vmem_limit_bytes raised); unnecessary at this size.
    keep = pl.pallas_call(
        functools.partial(_nms_kernel, iou_thresh=float(iou_threshold), n_real=N),
        out_shape=jax.ShapeDtypeStruct((1, Np), jnp.float32),
        grid=(1,),
        in_specs=[
            pl.BlockSpec((Np, 4), lambda i: (0, 0)),
            pl.BlockSpec((4, Np), lambda i: (0, 0)),
        ],
        out_specs=pl.BlockSpec((1, Np), lambda i: (0, 0)),
        scratch_shapes=[pltpu.VMEM((Np, Np), jnp.float32)],
        compiler_params=pltpu.CompilerParams(dimension_semantics=("arbitrary",)),
    )(boxes_padded, boxes_padded.T)

    keep_mask = keep[0, :N] > 0.5            # (N,) over score-sorted real boxes
    # Compact: kept indices first (preserving score order), -1 padding after.
    sort_key = jnp.where(keep_mask, 0, N) + jnp.arange(N)
    perm = jnp.argsort(sort_key)
    kept_idx = jnp.where(keep_mask[perm], order[perm], -1).astype(jnp.int32)
    num_kept = jnp.sum(keep_mask.astype(jnp.int32))
    return kept_idx, num_kept


class TinyModelPallas:
    """JAX/Pallas port of TinyModel.  Unused params are created for parity."""

    def __init__(self):
        key = jax.random.PRNGKey(0)
        kw, kb = jax.random.split(key)
        # nn.Conv1d(100, 1, 1, 1): weight (1, 100, 1), bias (1,) -- unused in forward.
        self.expander_w = jax.random.normal(kw, (1, 100, 1), jnp.float32) * 0.1
        self.expander_b = jax.random.normal(kb, (1,), jnp.float32) * 0.1
        self.atom = jnp.array([[0.22], [0.14], [0.1], [0.4]], jnp.float32)  # unused

    def forward(self, x):
        rois = x["rois"]
        scores = x["scores"]
        return nms_pallas(rois, scores, 0.2)


def _nms_reference(boxes, scores, thresh):
    """Pure-numpy greedy NMS (torchvision semantics) for verification."""
    boxes = np.asarray(boxes, np.float32)
    scores = np.asarray(scores, np.float32)
    order = np.argsort(-scores)
    keep = []
    suppressed = np.zeros(len(boxes), bool)
    areas = (boxes[:, 2] - boxes[:, 0]) * (boxes[:, 3] - boxes[:, 1])
    for ii in range(len(order)):
        i = order[ii]
        if suppressed[i]:
            continue
        keep.append(int(i))
        for jj in range(ii + 1, len(order)):
            j = order[jj]
            if suppressed[j]:
                continue
            xx1 = max(boxes[i, 0], boxes[j, 0]); yy1 = max(boxes[i, 1], boxes[j, 1])
            xx2 = min(boxes[i, 2], boxes[j, 2]); yy2 = min(boxes[i, 3], boxes[j, 3])
            inter = max(xx2 - xx1, 0.0) * max(yy2 - yy1, 0.0)
            iou = inter / (areas[i] + areas[j] - inter)
            if iou > thresh:
                suppressed[j] = True
    return np.array(keep, np.int32)


if __name__ == "__main__":
    N = 16
    key = jax.random.PRNGKey(0)
    k1, k2, k3 = jax.random.split(key, 3)
    xy = jax.random.uniform(k1, (N, 2), jnp.float32, 0.0, 10.0)
    wh = jax.random.uniform(k2, (N, 2), jnp.float32, 1.0, 6.0)
    rois = jnp.concatenate([xy, xy + wh], axis=1)              # (N, 4) x1,y1,x2,y2
    scores = jax.random.uniform(k3, (N,), jnp.float32)

    model = TinyModelPallas()
    kept_idx, num_kept = model.forward({"rois": rois, "scores": scores})
    kept_idx = jax.block_until_ready(kept_idx)
    num_kept = int(jax.block_until_ready(num_kept))

    ref = _nms_reference(np.asarray(rois), np.asarray(scores), 0.2)
    got = np.asarray(kept_idx)[:num_kept]
    assert num_kept == len(ref), (num_kept, len(ref))
    assert np.array_equal(got, ref), (got, ref)
    print("KERNEL_OK")
</pallas_src>

<mosaic_0001>
module attributes {stable_mosaic.version = 11 : i64} {
  func.func @_nms_kernel(%arg0: i32, %arg1: memref<128x4xf32, #tpu.memory_space<vmem>>, %arg2: memref<4x128xf32, #tpu.memory_space<vmem>>, %arg3: memref<1x128xf32, #tpu.memory_space<vmem>>, %arg4: memref<128x128xf32, #tpu.memory_space<vmem>>) attributes {dimension_semantics = [#tpu.dimension_semantics<arbitrary>], iteration_bounds = array<i64: 1>, scalar_prefetch = 0 : i64, scratch_operands = 1 : i64, tpu.core_type = #tpu.core_type<tc>, window_params = [{pipeline_mode = #tpu.pipeline_mode<synchronous>, transform_indices = @transform_0, window_bounds = array<i64: 128, 4>}, {pipeline_mode = #tpu.pipeline_mode<synchronous>, transform_indices = @transform_1, window_bounds = array<i64: 4, 128>}, {pipeline_mode = #tpu.pipeline_mode<synchronous>, transform_indices = @transform_2, window_bounds = array<i64: 1, 128>}]} {
    %c0 = arith.constant 0 : index
    %c0_0 = arith.constant 0 : index
    %0 = vector.load %arg1[%c0, %c0_0] : memref<128x4xf32, #tpu.memory_space<vmem>>, vector<128x4xf32>
    %c0_1 = arith.constant 0 : index
    %c0_2 = arith.constant 0 : index
    %1 = vector.load %arg2[%c0_1, %c0_2] : memref<4x128xf32, #tpu.memory_space<vmem>>, vector<4x128xf32>
    %2 = vector.extract_strided_slice %0 {offsets = [0, 0], sizes = [128, 1], strides = [1, 1]} : vector<128x4xf32> to vector<128x1xf32>
    %3 = vector.extract_strided_slice %0 {offsets = [0, 1], sizes = [128, 1], strides = [1, 1]} : vector<128x4xf32> to vector<128x1xf32>
    %4 = vector.extract_strided_slice %0 {offsets = [0, 2], sizes = [128, 1], strides = [1, 1]} : vector<128x4xf32> to vector<128x1xf32>
    %5 = vector.extract_strided_slice %0 {offsets = [0, 3], sizes = [128, 1], strides = [1, 1]} : vector<128x4xf32> to vector<128x1xf32>
    %6 = vector.extract_strided_slice %1 {offsets = [0, 0], sizes = [1, 128], strides = [1, 1]} : vector<4x128xf32> to vector<1x128xf32>
    %7 = vector.extract_strided_slice %1 {offsets = [1, 0], sizes = [1, 128], strides = [1, 1]} : vector<4x128xf32> to vector<1x128xf32>
    %8 = vector.extract_strided_slice %1 {offsets = [2, 0], sizes = [1, 128], strides = [1, 1]} : vector<4x128xf32> to vector<1x128xf32>
    %9 = vector.extract_strided_slice %1 {offsets = [3, 0], sizes = [1, 128], strides = [1, 1]} : vector<4x128xf32> to vector<1x128xf32>
    %10 = arith.subf %4, %2 : vector<128x1xf32>
    %11 = arith.subf %5, %3 : vector<128x1xf32>
    %12 = arith.mulf %10, %11 : vector<128x1xf32>
    %13 = arith.subf %8, %6 : vector<1x128xf32>
    %14 = arith.subf %9, %7 : vector<1x128xf32>
    %15 = arith.mulf %13, %14 : vector<1x128xf32>
    %16 = vector.broadcast %4 : vector<128x1xf32> to vector<128x128xf32>
    %17 = vector.broadcast %8 : vector<1x128xf32> to vector<128x128xf32>
    %18 = arith.minimumf %16, %17 : vector<128x128xf32>
    %19 = vector.broadcast %2 : vector<128x1xf32> to vector<128x128xf32>
    %20 = vector.broadcast %6 : vector<1x128xf32> to vector<128x128xf32>
    %21 = arith.maximumf %19, %20 : vector<128x128xf32>
    %22 = arith.subf %18, %21 : vector<128x128xf32>
    %cst = arith.constant 0.000000e+00 : f32
    %23 = vector.broadcast %cst : f32 to vector<128x128xf32>
    %24 = arith.maximumf %22, %23 : vector<128x128xf32>
    %25 = vector.broadcast %5 : vector<128x1xf32> to vector<128x128xf32>
    %26 = vector.broadcast %9 : vector<1x128xf32> to vector<128x128xf32>
    %27 = arith.minimumf %25, %26 : vector<128x128xf32>
    %28 = vector.broadcast %3 : vector<128x1xf32> to vector<128x128xf32>
    %29 = vector.broadcast %7 : vector<1x128xf32> to vector<128x128xf32>
    %30 = arith.maximumf %28, %29 : vector<128x128xf32>
    %31 = arith.subf %27, %30 : vector<128x128xf32>
    %cst_3 = arith.constant 0.000000e+00 : f32
    %32 = vector.broadcast %cst_3 : f32 to vector<128x128xf32>
    %33 = arith.maximumf %31, %32 : vector<128x128xf32>
    %34 = arith.mulf %24, %33 : vector<128x128xf32>
    %35 = vector.broadcast %12 : vector<128x1xf32> to vector<128x128xf32>
    %36 = vector.broadcast %15 : vector<1x128xf32> to vector<128x128xf32>
    %37 = arith.addf %35, %36 : vector<128x128xf32>
    %38 = arith.subf %37, %34 : vector<128x128xf32>
    %39 = tpu.iota {dimensions = array<i32: 0>} : vector<128x128xi32>
    %40 = tpu.iota {dimensions = array<i32: 1>} : vector<128x128xi32>
    %cst_4 = arith.constant 2.000000e-01 : f32
    %41 = vector.broadcast %cst_4 : f32 to vector<128x128xf32>
    %42 = arith.mulf %41, %38 : vector<128x128xf32>
    %43 = arith.cmpf ogt, %34, %42 : vector<128x128xf32>
    %44 = arith.cmpi sgt, %40, %39 : vector<128x128xi32>
    %45 = arith.andi %43, %44 : vector<128x128xi1>
    %cst_5 = arith.constant 1.000000e+00 : f32
    %cst_6 = arith.constant 0.000000e+00 : f32
    %46 = vector.broadcast %cst_5 : f32 to vector<128x128xf32>
    %47 = vector.broadcast %cst_6 : f32 to vector<128x128xf32>
    %48 = arith.select %45, %46, %47 : vector<128x128xi1>, vector<128x128xf32>
    %c0_7 = arith.constant 0 : index
    %c0_8 = arith.constant 0 : index
    %49 = vector.load %arg4[%c0_7, %c0_8] : memref<128x128xf32, #tpu.memory_space<vmem>>, vector<128x128xf32>
    tpu.vector_store %arg4[%c0_7, %c0_8], %48 {strides = array<i32>} : memref<128x128xf32, #tpu.memory_space<vmem>>, vector<128x128xf32>,
    %50 = tpu.iota {dimensions = array<i32: 1>} : vector<1x128xi32>
    %cst_9 = arith.constant 1.000000e+00 : f32
    %51 = vector.broadcast %cst_9 : f32 to vector<1x128xf32>
    %c0_i32 = arith.constant 0 : i32
    %52 = vector.broadcast %c0_i32 : i32 to vector<1x128xi32>
    %53 = arith.cmpi eq, %50, %52 : vector<1x128xi32>
    %cst_10 = arith.constant 0.000000e+00 : f32
    %54 = vector.broadcast %cst_10 : f32 to vector<1x128xf32>
    %55 = arith.select %53, %51, %54 : vector<1x128xi1>, vector<1x128xf32>
    %cst_11 = arith.constant dense<0.000000e+00> : vector<1xf32>
    %56 = vector.multi_reduction <add>, %55, %cst_11 [1] : vector<1x128xf32> to vector<1xf32>
    %57 = vector.shape_cast %56 : vector<1xf32> to vector<1x1xf32>
    %58 = arith.index_cast %c0_i32 : i32 to index
    %c0_12 = arith.constant 0 : index
    %59 = vector.load %arg4[%58, %c0_12] : memref<128x128xf32, #tpu.memory_space<vmem>>, vector<1x128xf32>
    %60 = vector.broadcast %57 : vector<1x1xf32> to vector<1x128xf32>
    %61 = arith.mulf %60, %59 : vector<1x128xf32>
    %cst_13 = arith.constant 1.000000e+00 : f32
    %62 = vector.broadcast %cst_13 : f32 to vector<1x128xf32>
    %63 = arith.subf %62, %61 : vector<1x128xf32>
    %64 = arith.mulf %51, %63 : vector<1x128xf32>
    %c1_i32 = arith.constant 1 : i32
    %65 = vector.broadcast %c1_i32 : i32 to vector<1x128xi32>
    %66 = arith.cmpi eq, %50, %65 : vector<1x128xi32>
    %cst_14 = arith.constant 0.000000e+00 : f32
    %67 = vector.broadcast %cst_14 : f32 to vector<1x128xf32>
    %68 = arith.select %66, %64, %67 : vector<1x128xi1>, vector<1x128xf32>
    %cst_15 = arith.constant dense<0.000000e+00> : vector<1xf32>
    %69 = vector.multi_reduction <add>, %68, %cst_15 [1] : vector<1x128xf32> to vector<1xf32>
    %70 = vector.shape_cast %69 : vector<1xf32> to vector<1x1xf32>
    %71 = arith.index_cast %c1_i32 : i32 to index
    %c0_16 = arith.constant 0 : index
    %72 = vector.load %arg4[%71, %c0_16] : memref<128x128xf32, #tpu.memory_space<vmem>>, vector<1x128xf32>
    %73 = vector.broadcast %70 : vector<1x1xf32> to vector<1x128xf32>
    %74 = arith.mulf %73, %72 : vector<1x128xf32>
    %cst_17 = arith.constant 1.000000e+00 : f32
    %75 = vector.broadcast %cst_17 : f32 to vector<1x128xf32>
    %76 = arith.subf %75, %74 : vector<1x128xf32>
    %77 = arith.mulf %64, %76 : vector<1x128xf32>
    %c2_i32 = arith.constant 2 : i32
    %78 = vector.broadcast %c2_i32 : i32 to vector<1x128xi32>
    %79 = arith.cmpi eq, %50, %78 : vector<1x128xi32>
    %cst_18 = arith.constant 0.000000e+00 : f32
    %80 = vector.broadcast %cst_18 : f32 to vector<1x128xf32>
    %81 = arith.select %79, %77, %80 : vector<1x128xi1>, vector<1x128xf32>
    %cst_19 = arith.constant dense<0.000000e+00> : vector<1xf32>
    %82 = vector.multi_reduction <add>, %81, %cst_19 [1] : vector<1x128xf32> to vector<1xf32>
    %83 = vector.shape_cast %82 : vector<1xf32> to vector<1x1xf32>
    %84 = arith.index_cast %c2_i32 : i32 to index
    %c0_20 = arith.constant 0 : index
    %85 = vector.load %arg4[%84, %c0_20] : memref<128x128xf32, #tpu.memory_space<vmem>>, vector<1x128xf32>
    %86 = vector.broadcast %83 : vector<1x1xf32> to vector<1x128xf32>
    %87 = arith.mulf %86, %85 : vector<1x128xf32>
    %cst_21 = arith.constant 1.000000e+00 : f32
    %88 = vector.broadcast %cst_21 : f32 to vector<1x128xf32>
    %89 = arith.subf %88, %87 : vector<1x128xf32>
    %90 = arith.mulf %77, %89 : vector<1x128xf32>
    %c3_i32 = arith.constant 3 : i32
    %91 = vector.broadcast %c3_i32 : i32 to vector<1x128xi32>
    %92 = arith.cmpi eq, %50, %91 : vector<1x128xi32>
    %cst_22 = arith.constant 0.000000e+00 : f32
    %93 = vector.broadcast %cst_22 : f32 to vector<1x128xf32>
    %94 = arith.select %92, %90, %93 : vector<1x128xi1>, vector<1x128xf32>
    %cst_23 = arith.constant dense<0.000000e+00> : vector<1xf32>
    %95 = vector.multi_reduction <add>, %94, %cst_23 [1] : vector<1x128xf32> to vector<1xf32>
    %96 = vector.shape_cast %95 : vector<1xf32> to vector<1x1xf32>
    %97 = arith.index_cast %c3_i32 : i32 to index
    %c0_24 = arith.constant 0 : index
    %98 = vector.load %arg4[%97, %c0_24] : memref<128x128xf32, #tpu.memory_space<vmem>>, vector<1x128xf32>
    %99 = vector.broadcast %96 : vector<1x1xf32> to vector<1x128xf32>
    %100 = arith.mulf %99, %98 : vector<1x128xf32>
    %cst_25 = arith.constant 1.000000e+00 : f32
    %101 = vector.broadcast %cst_25 : f32 to vector<1x128xf32>
    %102 = arith.subf %101, %100 : vector<1x128xf32>
    %103 = arith.mulf %90, %102 : vector<1x128xf32>
    %c4_i32 = arith.constant 4 : i32
    %104 = vector.broadcast %c4_i32 : i32 to vector<1x128xi32>
    %105 = arith.cmpi eq, %50, %104 : vector<1x128xi32>
    %cst_26 = arith.constant 0.000000e+00 : f32
    %106 = vector.broadcast %cst_26 : f32 to vector<1x128xf32>
    %107 = arith.select %105, %103, %106 : vector<1x128xi1>, vector<1x128xf32>
    %cst_27 = arith.constant dense<0.000000e+00> : vector<1xf32>
    %108 = vector.multi_reduction <add>, %107, %cst_27 [1] : vector<1x128xf32> to vector<1xf32>
    %109 = vector.shape_cast %108 : vector<1xf32> to vector<1x1xf32>
    %110 = arith.index_cast %c4_i32 : i32 to index
    %c0_28 = arith.constant 0 : index
    %111 = vector.load %arg4[%110, %c0_28] : memref<128x128xf32, #tpu.memory_space<vmem>>, vector<1x128xf32>
    %112 = vector.broadcast %109 : vector<1x1xf32> to vector<1x128xf32>
    %113 = arith.mulf %112, %111 : vector<1x128xf32>
    %cst_29 = arith.constant 1.000000e+00 : f32
    %114 = vector.broadcast %cst_29 : f32 to vector<1x128xf32>
    %115 = arith.subf %114, %113 : vector<1x128xf32>
    %116 = arith.mulf %103, %115 : vector<1x128xf32>
    %c5_i32 = arith.constant 5 : i32
    %117 = vector.broadcast %c5_i32 : i32 to vector<1x128xi32>
    %118 = arith.cmpi eq, %50, %117 : vector<1x128xi32>
    %cst_30 = arith.constant 0.000000e+00 : f32
    %119 = vector.broadcast %cst_30 : f32 to vector<1x128xf32>
    %120 = arith.select %118, %116, %119 : vector<1x128xi1>, vector<1x128xf32>
    %cst_31 = arith.constant dense<0.000000e+00> : vector<1xf32>
    %121 = vector.multi_reduction <add>, %120, %cst_31 [1] : vector<1x128xf32> to vector<1xf32>
    %122 = vector.shape_cast %121 : vector<1xf32> to vector<1x1xf32>
    %123 = arith.index_cast %c5_i32 : i32 to index
    %c0_32 = arith.constant 0 : index
    %124 = vector.load %arg4[%123, %c0_32] : memref<128x128xf32, #tpu.memory_space<vmem>>, vector<1x128xf32>
    %125 = vector.broadcast %122 : vector<1x1xf32> to vector<1x128xf32>
    %126 = arith.mulf %125, %124 : vector<1x128xf32>
    %cst_33 = arith.constant 1.000000e+00 : f32
    %127 = vector.broadcast %cst_33 : f32 to vector<1x128xf32>
    %128 = arith.subf %127, %126 : vector<1x128xf32>
    %129 = arith.mulf %116, %128 : vector<1x128xf32>
    %c6_i32 = arith.constant 6 : i32
    %130 = vector.broadcast %c6_i32 : i32 to vector<1x128xi32>
    %131 = arith.cmpi eq, %50, %130 : vector<1x128xi32>
    %cst_34 = arith.constant 0.000000e+00 : f32
    %132 = vector.broadcast %cst_34 : f32 to vector<1x128xf32>
    %133 = arith.select %131, %129, %132 : vector<1x128xi1>, vector<1x128xf32>
    %cst_35 = arith.constant dense<0.000000e+00> : vector<1xf32>
    %134 = vector.multi_reduction <add>, %133, %cst_35 [1] : vector<1x128xf32> to vector<1xf32>
    %135 = vector.shape_cast %134 : vector<1xf32> to vector<1x1xf32>
    %136 = arith.index_cast %c6_i32 : i32 to index
    %c0_36 = arith.constant 0 : index
    %137 = vector.load %arg4[%136, %c0_36] : memref<128x128xf32, #tpu.memory_space<vmem>>, vector<1x128xf32>
    %138 = vector.broadcast %135 : vector<1x1xf32> to vector<1x128xf32>
    %139 = arith.mulf %138, %137 : vector<1x128xf32>
    %cst_37 = arith.constant 1.000000e+00 : f32
    %140 = vector.broadcast %cst_37 : f32 to vector<1x128xf32>
    %141 = arith.subf %140, %139 : vector<1x128xf32>
    %142 = arith.mulf %129, %141 : vector<1x128xf32>
    %c7_i32 = arith.constant 7 : i32
    %143 = vector.broadcast %c7_i32 : i32 to vector<1x128xi32>
    %144 = arith.cmpi eq, %50, %143 : vector<1x128xi32>
    %cst_38 = arith.constant 0.000000e+00 : f32
    %145 = vector.broadcast %cst_38 : f32 to vector<1x128xf32>
    %146 = arith.select %144, %142, %145 : vector<1x128xi1>, vector<1x128xf32>
    %cst_39 = arith.constant dense<0.000000e+00> : vector<1xf32>
    %147 = vector.multi_reduction <add>, %146, %cst_39 [1] : vector<1x128xf32> to vector<1xf32>
    %148 = vector.shape_cast %147 : vector<1xf32> to vector<1x1xf32>
    %149 = arith.index_cast %c7_i32 : i32 to index
    %c0_40 = arith.constant 0 : index
    %150 = vector.load %arg4[%149, %c0_40] : memref<128x128xf32, #tpu.memory_space<vmem>>, vector<1x128xf32>
    %151 = vector.broadcast %148 : vector<1x1xf32> to vector<1x128xf32>
    %152 = arith.mulf %151, %150 : vector<1x128xf32>
    %cst_41 = arith.constant 1.000000e+00 : f32
    %153 = vector.broadcast %cst_41 : f32 to vector<1x128xf32>
    %154 = arith.subf %153, %152 : vector<1x128xf32>
    %155 = arith.mulf %142, %154 : vector<1x128xf32>
    %c8_i32 = arith.constant 8 : i32
    %156 = vector.broadcast %c8_i32 : i32 to vector<1x128xi32>
    %157 = arith.cmpi eq, %50, %156 : vector<1x128xi32>
    %cst_42 = arith.constant 0.000000e+00 : f32
    %158 = vector.broadcast %cst_42 : f32 to vector<1x128xf32>
    %159 = arith.select %157, %155, %158 : vector<1x128xi1>, vector<1x128xf32>
    %cst_43 = arith.constant dense<0.000000e+00> : vector<1xf32>
    %160 = vector.multi_reduction <add>, %159, %cst_43 [1] : vector<1x128xf32> to vector<1xf32>
    %161 = vector.shape_cast %160 : vector<1xf32> to vector<1x1xf32>
    %162 = arith.index_cast %c8_i32 : i32 to index
    %c0_44 = arith.constant 0 : index
    %163 = vector.load %arg4[%162, %c0_44] : memref<128x128xf32, #tpu.memory_space<vmem>>, vector<1x128xf32>
    %164 = vector.broadcast %161 : vector<1x1xf32> to vector<1x128xf32>
    %165 = arith.mulf %164, %163 : vector<1x128xf32>
    %cst_45 = arith.constant 1.000000e+00 : f32
    %166 = vector.broadcast %cst_45 : f32 to vector<1x128xf32>
    %167 = arith.subf %166, %165 : vector<1x128xf32>
    %168 = arith.mulf %155, %167 : vector<1x128xf32>
    %c9_i32 = arith.constant 9 : i32
    %169 = vector.broadcast %c9_i32 : i32 to vector<1x128xi32>
    %170 = arith.cmpi eq, %50, %169 : vector<1x128xi32>
    %cst_46 = arith.constant 0.000000e+00 : f32
    %171 = vector.broadcast %cst_46 : f32 to vector<1x128xf32>
    %172 = arith.select %170, %168, %171 : vector<1x128xi1>, vector<1x128xf32>
    %cst_47 = arith.constant dense<0.000000e+00> : vector<1xf32>
    %173 = vector.multi_reduction <add>, %172, %cst_47 [1] : vector<1x128xf32> to vector<1xf32>
    %174 = vector.shape_cast %173 : vector<1xf32> to vector<1x1xf32>
    %175 = arith.index_cast %c9_i32 : i32 to index
    %c0_48 = arith.constant 0 : index
    %176 = vector.load %arg4[%175, %c0_48] : memref<128x128xf32, #tpu.memory_space<vmem>>, vector<1x128xf32>
    %177 = vector.broadcast %174 : vector<1x1xf32> to vector<1x128xf32>
    %178 = arith.mulf %177, %176 : vector<1x128xf32>
    %cst_49 = arith.constant 1.000000e+00 : f32
    %179 = vector.broadcast %cst_49 : f32 to vector<1x128xf32>
    %180 = arith.subf %179, %178 : vector<1x128xf32>
    %181 = arith.mulf %168, %180 : vector<1x128xf32>
    %c10_i32 = arith.constant 10 : i32
    %182 = vector.broadcast %c10_i32 : i32 to vector<1x128xi32>
    %183 = arith.cmpi eq, %50, %182 : vector<1x128xi32>
    %cst_50 = arith.constant 0.000000e+00 : f32
    %184 = vector.broadcast %cst_50 : f32 to vector<1x128xf32>
    %185 = arith.select %183, %181, %184 : vector<1x128xi1>, vector<1x128xf32>
    %cst_51 = arith.constant dense<0.000000e+00> : vector<1xf32>
    %186 = vector.multi_reduction <add>, %185, %cst_51 [1] : vector<1x128xf32> to vector<1xf32>
    %187 = vector.shape_cast %186 : vector<1xf32> to vector<1x1xf32>
    %188 = arith.index_cast %c10_i32 : i32 to index
    %c0_52 = arith.constant 0 : index
    %189 = vector.load %arg4[%188, %c0_52] : memref<128x128xf32, #tpu.memory_space<vmem>>, vector<1x128xf32>
    %190 = vector.broadcast %187 : vector<1x1xf32> to vector<1x128xf32>
    %191 = arith.mulf %190, %189 : vector<1x128xf32>
    %cst_53 = arith.constant 1.000000e+00 : f32
    %192 = vector.broadcast %cst_53 : f32 to vector<1x128xf32>
    %193 = arith.subf %192, %191 : vector<1x128xf32>
    %194 = arith.mulf %181, %193 : vector<1x128xf32>
    %c11_i32 = arith.constant 11 : i32
    %195 = vector.broadcast %c11_i32 : i32 to vector<1x128xi32>
    %196 = arith.cmpi eq, %50, %195 : vector<1x128xi32>
    %cst_54 = arith.constant 0.000000e+00 : f32
    %197 = vector.broadcast %cst_54 : f32 to vector<1x128xf32>
    %198 = arith.select %196, %194, %197 : vector<1x128xi1>, vector<1x128xf32>
    %cst_55 = arith.constant dense<0.000000e+00> : vector<1xf32>
    %199 = vector.multi_reduction <add>, %198, %cst_55 [1] : vector<1x128xf32> to vector<1xf32>
    %200 = vector.shape_cast %199 : vector<1xf32> to vector<1x1xf32>
    %201 = arith.index_cast %c11_i32 : i32 to index
    %c0_56 = arith.constant 0 : index
    %202 = vector.load %arg4[%201, %c0_56] : memref<128x128xf32, #tpu.memory_space<vmem>>, vector<1x128xf32>
    %203 = vector.broadcast %200 : vector<1x1xf32> to vector<1x128xf32>
    %204 = arith.mulf %203, %202 : vector<1x128xf32>
    %cst_57 = arith.constant 1.000000e+00 : f32
    %205 = vector.broadcast %cst_57 : f32 to vector<1x128xf32>
    %206 = arith.subf %205, %204 : vector<1x128xf32>
    %207 = arith.mulf %194, %206 : vector<1x128xf32>
    %c12_i32 = arith.constant 12 : i32
    %208 = vector.broadcast %c12_i32 : i32 to vector<1x128xi32>
    %209 = arith.cmpi eq, %50, %208 : vector<1x128xi32>
    %cst_58 = arith.constant 0.000000e+00 : f32
    %210 = vector.broadcast %cst_58 : f32 to vector<1x128xf32>
    %211 = arith.select %209, %207, %210 : vector<1x128xi1>, vector<1x128xf32>
    %cst_59 = arith.constant dense<0.000000e+00> : vector<1xf32>
    %212 = vector.multi_reduction <add>, %211, %cst_59 [1] : vector<1x128xf32> to vector<1xf32>
    %213 = vector.shape_cast %212 : vector<1xf32> to vector<1x1xf32>
    %214 = arith.index_cast %c12_i32 : i32 to index
    %c0_60 = arith.constant 0 : index
    %215 = vector.load %arg4[%214, %c0_60] : memref<128x128xf32, #tpu.memory_space<vmem>>, vector<1x128xf32>
    %216 = vector.broadcast %213 : vector<1x1xf32> to vector<1x128xf32>
    %217 = arith.mulf %216, %215 : vector<1x128xf32>
    %cst_61 = arith.constant 1.000000e+00 : f32
    %218 = vector.broadcast %cst_61 : f32 to vector<1x128xf32>
    %219 = arith.subf %218, %217 : vector<1x128xf32>
    %220 = arith.mulf %207, %219 : vector<1x128xf32>
    %c13_i32 = arith.constant 13 : i32
    %221 = vector.broadcast %c13_i32 : i32 to vector<1x128xi32>
    %222 = arith.cmpi eq, %50, %221 : vector<1x128xi32>
    %cst_62 = arith.constant 0.000000e+00 : f32
    %223 = vector.broadcast %cst_62 : f32 to vector<1x128xf32>
    %224 = arith.select %222, %220, %223 : vector<1x128xi1>, vector<1x128xf32>
    %cst_63 = arith.constant dense<0.000000e+00> : vector<1xf32>
    %225 = vector.multi_reduction <add>, %224, %cst_63 [1] : vector<1x128xf32> to vector<1xf32>
    %226 = vector.shape_cast %225 : vector<1xf32> to vector<1x1xf32>
    %227 = arith.index_cast %c13_i32 : i32 to index
    %c0_64 = arith.constant 0 : index
    %228 = vector.load %arg4[%227, %c0_64] : memref<128x128xf32, #tpu.memory_space<vmem>>, vector<1x128xf32>
    %229 = vector.broadcast %226 : vector<1x1xf32> to vector<1x128xf32>
    %230 = arith.mulf %229, %228 : vector<1x128xf32>
    %cst_65 = arith.constant 1.000000e+00 : f32
    %231 = vector.broadcast %cst_65 : f32 to vector<1x128xf32>
    %232 = arith.subf %231, %230 : vector<1x128xf32>
    %233 = arith.mulf %220, %232 : vector<1x128xf32>
    %c14_i32 = arith.constant 14 : i32
    %234 = vector.broadcast %c14_i32 : i32 to vector<1x128xi32>
    %235 = arith.cmpi eq, %50, %234 : vector<1x128xi32>
    %cst_66 = arith.constant 0.000000e+00 : f32
    %236 = vector.broadcast %cst_66 : f32 to vector<1x128xf32>
    %237 = arith.select %235, %233, %236 : vector<1x128xi1>, vector<1x128xf32>
    %cst_67 = arith.constant dense<0.000000e+00> : vector<1xf32>
    %238 = vector.multi_reduction <add>, %237, %cst_67 [1] : vector<1x128xf32> to vector<1xf32>
    %239 = vector.shape_cast %238 : vector<1xf32> to vector<1x1xf32>
    %240 = arith.index_cast %c14_i32 : i32 to index
    %c0_68 = arith.constant 0 : index
    %241 = vector.load %arg4[%240, %c0_68] : memref<128x128xf32, #tpu.memory_space<vmem>>, vector<1x128xf32>
    %242 = vector.broadcast %239 : vector<1x1xf32> to vector<1x128xf32>
    %243 = arith.mulf %242, %241 : vector<1x128xf32>
    %cst_69 = arith.constant 1.000000e+00 : f32
    %244 = vector.broadcast %cst_69 : f32 to vector<1x128xf32>
    %245 = arith.subf %244, %243 : vector<1x128xf32>
    %246 = arith.mulf %233, %245 : vector<1x128xf32>
    %c15_i32 = arith.constant 15 : i32
    %247 = vector.broadcast %c15_i32 : i32 to vector<1x128xi32>
    %248 = arith.cmpi eq, %50, %247 : vector<1x128xi32>
    %cst_70 = arith.constant 0.000000e+00 : f32
    %249 = vector.broadcast %cst_70 : f32 to vector<1x128xf32>
    %250 = arith.select %248, %246, %249 : vector<1x128xi1>, vector<1x128xf32>
    %cst_71 = arith.constant dense<0.000000e+00> : vector<1xf32>
    %251 = vector.multi_reduction <add>, %250, %cst_71 [1] : vector<1x128xf32> to vector<1xf32>
    %252 = vector.shape_cast %251 : vector<1xf32> to vector<1x1xf32>
    %253 = arith.index_cast %c15_i32 : i32 to index
    %c0_72 = arith.constant 0 : index
    %254 = vector.load %arg4[%253, %c0_72] : memref<128x128xf32, #tpu.memory_space<vmem>>, vector<1x128xf32>
    %255 = vector.broadcast %252 : vector<1x1xf32> to vector<1x128xf32>
    %256 = arith.mulf %255, %254 : vector<1x128xf32>
    %cst_73 = arith.constant 1.000000e+00 : f32
    %257 = vector.broadcast %cst_73 : f32 to vector<1x128xf32>
    %258 = arith.subf %257, %256 : vector<1x128xf32>
    %259 = arith.mulf %246, %258 : vector<1x128xf32>
    %c16_i32 = arith.constant 16 : i32
    %c0_74 = arith.constant 0 : index
    %c0_75 = arith.constant 0 : index
    %260 = vector.load %arg3[%c0_74, %c0_75] : memref<1x128xf32, #tpu.memory_space<vmem>>, vector<1x128xf32>
    tpu.vector_store %arg3[%c0_74, %c0_75], %259 {strides = array<i32>} : memref<1x128xf32, #tpu.memory_space<vmem>>, vector<1x128xf32>,
    return
  }
  func.func @transform_0(%arg0: i32) -> (i32, i32) {
    %c0_i32 = arith.constant 0 : i32
    %c0_i32_0 = arith.constant 0 : i32
    %c0_i32_1 = arith.constant 0 : i32
    return %c0_i32, %c0_i32_0 : i32, i32
  }
  func.func @transform_1(%arg0: i32) -> (i32, i32) {
    %c0_i32 = arith.constant 0 : i32
    %c0_i32_0 = arith.constant 0 : i32
    %c0_i32_1 = arith.constant 0 : i32
    return %c0_i32, %c0_i32_0 : i32, i32
  }
  func.func @transform_2(%arg0: i32) -> (i32, i32) {
    %c0_i32 = arith.constant 0 : i32
    %c0_i32_0 = arith.constant 0 : i32
    %c0_i32_1 = arith.constant 0 : i32
    return %c0_i32, %c0_i32_0 : i32, i32
  }
}

</mosaic_0001>

<bundles_post_ra>
// kernel: tpu_custom_call.1
= control target key start
LH: loop header
LB: loop body
LE: loop exit
PB: predicated region body
PF: predicated region fallthrough
CT: control target
= control target key end

     0   :  { %s1052_s11 = smov 2   ;;  %v1053_v1 = vmov 2   ;;  %s1463_s0 = inlined_call_operand.vmem [shape: f32[128,4], index: 0, kind: input, shape index: {}]   ;;  %s1464_s1 = inlined_call_operand.vmem [shape: f32[4,128], index: 1, kind: input, shape index: {}]   ;;  %s1465_s2 = inlined_call_operand.hbm [shape: f32[1,128], index: 2, kind: output, shape index: {}]  }
   0x1   :  { %v12_v0 = vld [vmem:[%s1463_s0] sm:$0xff]  ;;  %1010 = vset.pattern.permute.xlu1 %v1053_v1 }
   0x2   :  { %45 = vrot.lane.b32.xlu0 %v12_v0, %s1052_s11 }
   0x3   :  { %7 = vsyncpa [#allocation4], 0  ;;  %198 = vperm.xlu1 %1010, %v12_v0   ;;  %v1054_v2 = vmov 3   ;;  %v1055_v3 = vmov 0   ;;  %v1056_v4 = vmov 1   ;;  %s1057_s12 = smov 127   ;;  %v261_v7 = vlaneseq }
   0x4   :  { %1012 = vset.pattern.permute.xlu0 %v1054_v2  ;;  %v1058_v9 = vmov 0.0   ;;  %v28_v15 = vld [vmem:[%s1464_s1] sm:$0xf]  ;;  %vm853_vm5 = vcmask 1040384  }
   0x5   :  { %v1086_v8 = vand.u32 127, %v261_v7  ;;  %v1091_v14 = vshrl.u32 %v261_v7, 7  ;;  %v190_v21 = vrot.slane %v28_v15, 6 }
   0x7   :  { %1011 = vset.pattern.permute.xlu1 %v1055_v3  ;;  %vm844_vm0 = vcmp.eq.s32.totalorder %v1086_v8, 0  ;;  %v263_v16 = vsub.s32 2, %v1091_v14  ;;  %v347_v18 = vsub.s32 0, %v1091_v14  ;;  %v547_v19 = vsub.s32 1, %v1091_v14 }
   0x8   :  { %282 = vperm.xlu1 %1011, %v12_v0   ;;  %v845_v10 = vsel %vm844_vm0, 1.0, %v1058_v9  ;;  %v463_v20 = vsub.s32 3, %v1091_v14  ;;  %v192_v26 = vsub.f32 %v28_v15, %v190_v21  ;;  %vm780_vm1 = vcmp.gt.s32.totalorder %v1086_v8, %v1091_v14 }
   0x9   :  { %v1100_v22 = vrot.slane %v28_v15, %v263_v16  ;;  %v1102_v23 = vrot.slane %v28_v15, %v347_v18  ;;  %v1104_v24 = vrot.slane %v28_v15, %v547_v19  ;;  %vm851_vm4 = vcmp.eq.s32.totalorder %v1086_v8, 1 }
   0xa   :  { %v1106_v25 = vrot.slane %v28_v15, %v463_v20  ;;  %v194_v33 = vrot.slane %v192_v26, 1  ;;  %vm861_vm6 = vcmp.eq.s32.totalorder %v1086_v8, 2  ;;  %vm870_vm7 = vcmp.eq.s32.totalorder %v1086_v8, 3 }
   0xb   :  { %vm879_vm8 = vcmp.eq.s32.totalorder %v1086_v8, 4  ;;  %vm888_vm9 = vcmp.eq.s32.totalorder %v1086_v8, 5  ;;  %vm897_vm10 = vcmp.eq.s32.totalorder %v1086_v8, 6  ;;  %vm906_vm11 = vcmp.eq.s32.totalorder %v1086_v8, 7 }
   0xc   :  { %1013 = vset.pattern.permute.xlu1 %v1056_v4  ;;  %v196_v36 = vmul.f32 %v194_v33, %v192_v26  ;;  %vm915_vm12 = vcmp.eq.s32.totalorder %v1086_v8, 8  ;;  %vm924_vm0 = vcmp.eq.s32.totalorder %v1086_v8, 9 }
   0xd   :  { %482 = vperm.xlu1 %1013, %v12_v0  }
   0xe   :  { %v1112_v39 = vrot.slane %v196_v36, %v263_v16 }
  0x11   :  { %1014 = vset.pattern.permute.xlu1 %v1053_v1 }
  0x74   :  { %v46_v5 = vpop.permute.xlu0 %45 }
  0x75   :  { %v93_v6 = vsub.f32 %v12_v0, %v46_v5 }
  0x77   :  { %125 = vrot.lane.b32.xlu0 %v93_v6, %s1057_s12 }
  0x7b   :  { %398 = vperm.xlu0 %1012, %v12_v0  }
  0x7f   :  { %1015 = vset.pattern.permute.xlu0 %v1053_v1 }
  0x82   :  { %v199_v13 = vpop.permute.xlu1 %198 }
  0x83   :  { %v265_v29 = vmin.f32 %v199_v13, %v1100_v22 }
  0x87   :  { %v283_v17 = vpop.permute.xlu1 %282 }
  0x88   :  { %v349_v30 = vmax.f32 %v283_v17, %v1102_v23 }
  0x8a   :  { %v365_v34 = vsub.f32 %v265_v29, %v349_v30 }
  0x8c   :  { %v483_v27 = vpop.permute.xlu1 %482  ;;  %v381_v37 = vmax.f32 %v365_v34, 0.0 }
  0x8d   :  { %v549_v31 = vmax.f32 %v483_v27, %v1104_v24  ;;  %v13_v27 = vld [vmem:[%s1463_s0 + $0x8] sm:$0xff] }
  0x9a   :  { %846 = vadd.xlane.f32.xlu0 %v845_v10 }
  0xe9   :  { %v126_v11 = vpop.permute.xlu0 %125 }
  0xea   :  { %v173_v12 = vmul.f32 %v126_v11, %v93_v6 }
  0xec   :  { %615 = vperm.xlu1 %1014, %v173_v12  }
  0xf0   :  { %1016 = vset.pattern.permute.xlu1 %v1055_v3 }
  0xfa   :  { %v399_v28 = vpop.permute.xlu0 %398 }
  0xfb   :  { %v465_v32 = vmin.f32 %v399_v28, %v1106_v25 }
  0xfd   :  { %v565_v35 = vsub.f32 %v465_v32, %v549_v31 }
  0xff   :  { %v581_v38 = vmax.f32 %v565_v35, 0.0 }
 0x101   :  { %v597_v41 = vmul.f32 %v581_v38, %v381_v37 }
 0x127   :  { %v847_v46 = vpop.xlane.xlu0 %846 }
 0x16b   :  { %v616_v40 = vpop.permute.xlu1 %615 }
 0x16c   :  { %v697_v42 = vadd.f32 %v1112_v39, %v616_v40 }
 0x16e   :  { %v713_v43 = vsub.f32 %v697_v42, %v597_v41 }
 0x170   :  { %v748_v44 = vmul.f32 0.2, %v713_v43 }
 0x172   :  { %vm764_vm2 = vcmp.gt.f32.partialorder %v597_v41, %v748_v44 }
 0x173   :  { %vm796_vm3 = vmand %vm764_vm2, %vm780_vm1  ;;  %vm933_vm1 = vcmp.eq.s32.totalorder %v1086_v8, 10  ;;  %vm942_vm2 = vcmp.eq.s32.totalorder %v1086_v8, 11 }
 0x174   :  { %v812_v45 = vsel %vm796_vm3, 1.0, %v1058_v9  ;;  %vm951_vm3 = vcmp.eq.s32.totalorder %v1086_v8, 12 }
 0x175   :  { %828 = vst [vmem:[#allocation2] sm:$0xff] %v812_v45 }
 0x17c   :  { %v848_v47 = vld [vmem:[#allocation2] sm:$0x1]  ;;  %v857_v52 = vld [vmem:[#allocation2 + $0x1] sm:$0x1]  ;;  %v866_v59 = vld [vmem:[#allocation2 + $0x2] sm:$0x1] }
 0x17d   :  { %v849_v48 = vmul.f32 %v848_v47, %v847_v46  ;;  %v875_v6 = vld [vmem:[#allocation2 + $0x3] sm:$0x1]  ;;  %v884_v16 = vld [vmem:[#allocation2 + $0x4] sm:$0x1]  ;;  %v893_v28 = vld [vmem:[#allocation2 + $0x5] sm:$0x1] }
 0x17e   :  { %v902_v35 = vld [vmem:[#allocation2 + $0x6] sm:$0x1] }
 0x17f   :  { %v850_v49 = vsub.f32 1.0, %v849_v48  ;;  %v911_v48 = vld [vmem:[#allocation2 + $0x7] sm:$0x1] }
 0x181   :  { %v852_v50 = vsel %vm851_vm4, %v850_v49, 0.0  ;;  %vm960_vm4 = vcmp.eq.s32.totalorder %v1086_v8, 13 }
 0x182   :  { %v854_v51 = vsel %vm853_vm5, %v852_v50, 0.0 }
 0x183   :  { %855 = vadd.xlane.f32.xlu1 %v854_v51 }
 0x210   :  { %v856_v53 = vpop.xlane.xlu1 %855 }
 0x211   :  { %v858_v54 = vmul.f32 %v857_v52, %v856_v53 }
 0x213   :  { %v859_v55 = vsub.f32 1.0, %v858_v54 }
 0x215   :  { %v860_v56 = vmul.f32 %v859_v55, %v850_v49 }
 0x217   :  { %v862_v57 = vsel %vm861_vm6, %v860_v56, 0.0  ;;  %vm969_vm6 = vcmp.eq.s32.totalorder %v1086_v8, 14 }
 0x218   :  { %v863_v58 = vsel %vm853_vm5, %v862_v57, 0.0 }
 0x219   :  { %864 = vadd.xlane.f32.xlu0 %v863_v58 }
 0x2a6   :  { %v865_v60 = vpop.xlane.xlu0 %864 }
 0x2a7   :  { %v867_v61 = vmul.f32 %v866_v59, %v865_v60 }
 0x2a9   :  { %v868_v62 = vsub.f32 1.0, %v867_v61 }
 0x2ab   :  { %v869_v63 = vmul.f32 %v868_v62, %v860_v56 }
 0x2ad   :  { %v871_v0 = vsel %vm870_vm7, %v869_v63, 0.0  ;;  %vm978_vm7 = vcmp.eq.s32.totalorder %v1086_v8, 15 }
 0x2ae   :  { %v872_v5 = vsel %vm853_vm5, %v871_v0, 0.0 }
 0x2af   :  { %873 = vadd.xlane.f32.xlu0 %v872_v5 }
 0x33c   :  { %v874_v7 = vpop.xlane.xlu0 %873 }
 0x33d   :  { %v876_v10 = vmul.f32 %v875_v6, %v874_v7  ;;  %v731_v7 = vadd.s32 8, %v1091_v14 }
 0x33f   :  { %v877_v11 = vsub.f32 1.0, %v876_v10  ;;  %vm781_vm13 = vcmp.gt.s32.totalorder %v1086_v8, %v731_v7 }
 0x341   :  { %v878_v12 = vmul.f32 %v877_v11, %v869_v63 }
 0x343   :  { %v880_v13 = vsel %vm879_vm8, %v878_v12, 0.0 }
 0x344   :  { %v881_v15 = vsel %vm853_vm5, %v880_v13, 0.0 }
 0x345   :  { %882 = vadd.xlane.f32.xlu1 %v881_v15 }
 0x3d2   :  { %v883_v17 = vpop.xlane.xlu1 %882 }
 0x3d3   :  { %v885_v18 = vmul.f32 %v884_v16, %v883_v17 }
 0x3d5   :  { %v886_v19 = vsub.f32 1.0, %v885_v18 }
 0x3d7   :  { %v887_v20 = vmul.f32 %v886_v19, %v878_v12 }
 0x3d9   :  { %v889_v21 = vsel %vm888_vm9, %v887_v20, 0.0 }
 0x3da   :  { %v890_v26 = vsel %vm853_vm5, %v889_v21, 0.0 }
 0x3db   :  { %891 = vadd.xlane.f32.xlu0 %v890_v26 }
 0x3f1   :  { %47 = vrot.lane.b32.xlu0 %v13_v27, %s1052_s11 }
 0x3f5   :  { %202 = vperm.xlu0 %1015, %v13_v27  }
 0x3f9   :  { %1018 = vset.pattern.permute.xlu0 %v1056_v4 }
 0x3fa   :  { %486 = vperm.xlu0 %1018, %v13_v27  }
 0x3fe   :  { %1020 = vset.pattern.permute.xlu0 %v1055_v3 }
 0x468   :  { %v892_v29 = vpop.xlane.xlu0 %891 }
 0x469   :  { %v894_v30 = vmul.f32 %v893_v28, %v892_v29  ;;  %v1165_v28 = vld [vmem:[%s1463_s0 + $0x30] sm:$0xff]  ;;  %v1172_v29 = vld [vmem:[%s1463_s0 + $0x40] sm:$0xff] }
 0x46b   :  { %v895_v31 = vsub.f32 1.0, %v894_v30  ;;  %v1179_v30 = vld [vmem:[%s1463_s0 + $0x50] sm:$0xff] }
 0x46c   :  { %v48_v43 = vpop.permute.xlu0 %47 }
 0x46d   :  { %v896_v32 = vmul.f32 %v895_v31, %v887_v20  ;;  %v94_v44 = vsub.f32 %v13_v27, %v48_v43  ;;  %v1186_v31 = vld [vmem:[%s1463_s0 + $0x60] sm:$0xff]  ;;  %v1216_v43 = vld [vmem:[%s1463_s0 + $0x28] sm:$0xff] }
 0x46f   :  { %v898_v33 = vsel %vm897_vm10, %v896_v32, 0.0 }
 0x470   :  { %v899_v34 = vsel %vm853_vm5, %v898_v33, 0.0 }
 0x471   :  { %900 = vadd.xlane.f32.xlu1 %v899_v34 }
 0x474   :  { %v203_v55 = vpop.permute.xlu0 %202 }
 0x475   :  { %v266_v59 = vmin.f32 %v203_v55, %v1100_v22 }
 0x479   :  { %v487_v57 = vpop.permute.xlu0 %486 }
 0x47a   :  { %v550_v61 = vmax.f32 %v487_v57, %v1104_v24 }
 0x4fe   :  { %v901_v36 = vpop.xlane.xlu1 %900 }
 0x4ff   :  { %v903_v37 = vmul.f32 %v902_v35, %v901_v36 }
 0x501   :  { %v904_v38 = vsub.f32 1.0, %v903_v37 }
 0x503   :  { %v905_v40 = vmul.f32 %v904_v38, %v896_v32  ;;  %v1193_v32 = vld [vmem:[%s1463_s0 + $0x70] sm:$0xff] }
 0x505   :  { %v907_v41 = vsel %vm906_vm11, %v905_v40, 0.0 }
 0x506   :  { %v908_v42 = vsel %vm853_vm5, %v907_v41, 0.0  ;;  %v1202_v41 = vld [vmem:[%s1463_s0 + $0x10] sm:$0xff] }
 0x507   :  { %909 = vadd.xlane.f32.xlu1 %v908_v42  ;;  %v1209_v42 = vld [vmem:[%s1463_s0 + $0x20] sm:$0xff] }
 0x518   :  { %127 = vrot.lane.b32.xlu1 %v94_v44, %s1057_s12 }
 0x51c   :  { %286 = vperm.xlu1 %1016, %v13_v27  }
 0x520   :  { %1017 = vset.pattern.permute.xlu1 %v1054_v2 }
 0x521   :  { %402 = vperm.xlu1 %1017, %v13_v27   ;;  %v1158_v27 = vld [vmem:[%s1463_s0 + $0x18] sm:$0xff] }
 0x525   :  { %1019 = vset.pattern.permute.xlu1 %v1053_v1 }
 0x594   :  { %v910_v45 = vpop.xlane.xlu1 %909 }
 0x595   :  { %v912_v49 = vmul.f32 %v911_v48, %v910_v45  ;;  %v1230_v45 = vld [vmem:[%s1463_s0 + $0x48] sm:$0xff]  ;;  %v1251_v48 = vld [vmem:[%s1463_s0 + $0x78] sm:$0xff] }
 0x597   :  { %v913_v50 = vsub.f32 1.0, %v912_v49 }
 0x598   :  { %v128_v46 = vpop.permute.xlu1 %127 }
 0x599   :  { %v174_v47 = vmul.f32 %v128_v46, %v94_v44  ;;  %v914_v51 = vmul.f32 %v913_v50, %v905_v40  ;;  %v1223_v44 = vld [vmem:[%s1463_s0 + $0x38] sm:$0xff] }
 0x59a   :  { %v1237_v46 = vld [vmem:[%s1463_s0 + $0x58] sm:$0xff] }
 0x59b   :  { %620 = vperm.xlu1 %1019, %v174_v47   ;;  %v916_v52 = vsel %vm915_vm12, %v914_v51, 0.0  ;;  %v1244_v47 = vld [vmem:[%s1463_s0 + $0x68] sm:$0xff]  ;;  %s1059_s0 = smov [#allocation3]  }
 0x59c   :  { %v917_v53 = vsel %vm853_vm5, %v916_v52, 0.0  ;;  %v287_v54 = vpop.permute.xlu1 %286 }
 0x59d   :  { %v350_v58 = vmax.f32 %v287_v54, %v1102_v23 }
 0x59f   :  { %v366_v62 = vsub.f32 %v266_v59, %v350_v58 }
 0x5a0   :  { %v403_v56 = vpop.permute.xlu1 %402 }
 0x5a1   :  { %v466_v60 = vmin.f32 %v403_v56, %v1106_v25  ;;  %v382_v0 = vmax.f32 %v366_v62, 0.0 }
 0x5a3   :  { %v566_v63 = vsub.f32 %v466_v60, %v550_v61 }
 0x5a5   :  { %v582_v5 = vmax.f32 %v566_v63, 0.0 }
 0x5a7   :  { %v598_v10 = vmul.f32 %v582_v5, %v382_v0 }
 0x5bf   :  { %918 = vadd.xlane.f32.xlu1 %v917_v53 }
 0x61a   :  { %v621_v6 = vpop.permute.xlu1 %620 }
 0x61b   :  { %v698_v11 = vadd.f32 %v1112_v39, %v621_v6 }
 0x61d   :  { %v714_v12 = vsub.f32 %v698_v11, %v598_v10 }
 0x61f   :  { %v749_v23 = vmul.f32 0.2, %v714_v12 }
 0x621   :  { %vm765_vm14 = vcmp.gt.f32.partialorder %v598_v10, %v749_v23 }
 0x622   :  { %vm797_vm15 = vmand %vm765_vm14, %vm781_vm13 }
 0x623   :  { %v813_v22 = vsel %vm797_vm15, 1.0, %v1058_v9 }
 0x624   :  { %829 = vst [vmem:[#allocation2 + $0x8] sm:$0xff] %v813_v22 }
 0x62b   :  { %v920_v25 = vld [vmem:[#allocation2 + $0x8] sm:$0x1]  ;;  %v929_v39 = vld [vmem:[#allocation2 + $0x9] sm:$0x1]  ;;  %v938_v33 = vld [vmem:[#allocation2 + $0xa] sm:$0x1] }
 0x62c   :  { %v947_v12 = vld [vmem:[#allocation2 + $0xb] sm:$0x1] }
 0x64c   :  { %v919_v24 = vpop.xlane.xlu1 %918 }
 0x64d   :  { %v921_v13 = vmul.f32 %v920_v25, %v919_v24 }
 0x64f   :  { %v922_v15 = vsub.f32 1.0, %v921_v13 }
 0x651   :  { %v923_v16 = vmul.f32 %v922_v15, %v914_v51 }
 0x653   :  { %v925_v14 = vsel %vm924_vm0, %v923_v16, 0.0 }
 0x654   :  { %v926_v17 = vsel %vm853_vm5, %v925_v14, 0.0 }
 0x655   :  { %927 = vadd.xlane.f32.xlu0 %v926_v17 }
 0x6e2   :  { %v928_v18 = vpop.xlane.xlu0 %927 }
 0x6e3   :  { %v930_v19 = vmul.f32 %v929_v39, %v928_v18 }
 0x6e5   :  { %v931_v20 = vsub.f32 1.0, %v930_v19 }
 0x6e7   :  { %v932_v21 = vmul.f32 %v931_v20, %v923_v16 }
 0x6e9   :  { %v934_v9 = vsel %vm933_vm1, %v932_v21, 0.0 }
 0x6ea   :  { %v935_v26 = vsel %vm853_vm5, %v934_v9, 0.0 }
 0x6eb   :  { %936 = vadd.xlane.f32.xlu0 %v935_v26 }
 0x701   :  { %51 = vrot.lane.b32.xlu0 %v1158_v27, %s1052_s11 }
 0x705   :  { %57 = vrot.lane.b32.xlu0 %v1165_v28, %s1052_s11 }
 0x709   :  { %61 = vrot.lane.b32.xlu0 %v1172_v29, %s1052_s11 }
 0x70d   :  { %65 = vrot.lane.b32.xlu0 %v1179_v30, %s1052_s11 }
 0x711   :  { %69 = vrot.lane.b32.xlu0 %v1186_v31, %s1052_s11 }
 0x715   :  { %73 = vrot.lane.b32.xlu0 %v1193_v32, %s1052_s11 }
 0x778   :  { %v937_v34 = vpop.xlane.xlu0 %936 }
 0x779   :  { %v939_v35 = vmul.f32 %v938_v33, %v937_v34 }
 0x77b   :  { %v940_v36 = vsub.f32 1.0, %v939_v35 }
 0x77c   :  { %v52_v49 = vpop.permute.xlu0 %51 }
 0x77d   :  { %v941_v37 = vmul.f32 %v940_v36, %v932_v21  ;;  %v1256_v50 = vsub.f32 %v1158_v27, %v52_v49 }
 0x77f   :  { %v943_v38 = vsel %vm942_vm2, %v941_v37, 0.0 }
 0x780   :  { %v944_v40 = vsel %vm853_vm5, %v943_v38, 0.0  ;;  %v58_v55 = vpop.permute.xlu0 %57 }
 0x781   :  { %945 = vadd.xlane.f32.xlu1 %v944_v40  ;;  %v1271_v57 = vsub.f32 %v1165_v28, %v58_v55  ;;  %v956_v55 = vld [vmem:[#allocation2 + $0xc] sm:$0x1] }
 0x784   :  { %v62_v59 = vpop.permute.xlu0 %61 }
 0x785   :  { %v1326_v19 = vsub.f32 %v1172_v29, %v62_v59 }
 0x788   :  { %v66_v63 = vpop.permute.xlu0 %65 }
 0x789   :  { %v1330_v20 = vsub.f32 %v1179_v30, %v66_v63 }
 0x78c   :  { %v70_v7 = vpop.permute.xlu0 %69 }
 0x78d   :  { %v1296_v11 = vsub.f32 %v1186_v31, %v70_v7 }
 0x790   :  { %v74_v25 = vpop.permute.xlu0 %73 }
 0x791   :  { %v1306_v15 = vsub.f32 %v1193_v32, %v74_v25 }
 0x792   :  { %49 = vrot.lane.b32.xlu1 %v1202_v41, %s1052_s11 }
 0x796   :  { %53 = vrot.lane.b32.xlu1 %v1209_v42, %s1052_s11 }
 0x79a   :  { %55 = vrot.lane.b32.xlu1 %v1216_v43, %s1052_s11 }
 0x79e   :  { %59 = vrot.lane.b32.xlu1 %v1223_v44, %s1052_s11 }
 0x7a2   :  { %63 = vrot.lane.b32.xlu1 %v1230_v45, %s1052_s11 }
 0x7a6   :  { %67 = vrot.lane.b32.xlu1 %v1237_v46, %s1052_s11 }
 0x7aa   :  { %71 = vrot.lane.b32.xlu1 %v1244_v47, %s1052_s11 }
 0x7ae   :  { %75 = vrot.lane.b32.xlu1 %v1251_v48, %s1052_s11  ;;  %s994_s11 = sshll.u32 %s1059_s0, 4  ;;  %s995_s11 = int_to_ptr.vmem [resolvable:$true] %s994_s11 }
 0x7af   :  { %s1032_s17 = scalar_lea.vmem %s995_s11, 32  ;;  %p1033_p1 = scmp.lt.s32.totalorder %s995_s11, %s995_s11 }
 0x7b2   :  { %131 = vrot.lane.b32.xlu1 %v1256_v50, %s1057_s12 }
 0x80e   :  { %v946_v51 = vpop.xlane.xlu1 %945 }
 0x80f   :  { %v948_v23 = vmul.f32 %v947_v12, %v946_v51 }
 0x811   :  { %v949_v13 = vsub.f32 1.0, %v948_v23 }
 0x812   :  { %v50_v52 = vpop.permute.xlu1 %49 }
 0x813   :  { %v1261_v53 = vsub.f32 %v1202_v41, %v50_v52  ;;  %v1308_v14 = vmul.f32 %v949_v13, %v941_v37 }
 0x815   :  { %129 = vrot.lane.b32.xlu0 %v1261_v53, %s1057_s12  ;;  %v952_v39 = vsel %vm951_vm3, %v1308_v14, 0.0 }
 0x816   :  { %v54_v54 = vpop.permute.xlu1 %53  ;;  %v953_v18 = vsel %vm853_vm5, %v952_v39, 0.0 }
 0x817   :  { %v1266_v56 = vsub.f32 %v1209_v42, %v54_v54 }
 0x819   :  { %133 = vrot.lane.b32.xlu0 %v1266_v56, %s1057_s12 }
 0x81a   :  { %v56_v58 = vpop.permute.xlu1 %55 }
 0x81b   :  { %v1274_v60 = vsub.f32 %v1216_v43, %v56_v58 }
 0x81d   :  { %135 = vrot.lane.b32.xlu1 %v1274_v60, %s1057_s12  ;;  %137 = vrot.lane.b32.xlu0 %v1271_v57, %s1057_s12 }
 0x81e   :  { %v60_v61 = vpop.permute.xlu1 %59 }
 0x81f   :  { %v1281_v62 = vsub.f32 %v1223_v44, %v60_v61 }
 0x821   :  { %139 = vrot.lane.b32.xlu1 %v1281_v62, %s1057_s12 }
 0x822   :  { %v64_v0 = vpop.permute.xlu1 %63 }
 0x823   :  { %v1286_v5 = vsub.f32 %v1230_v45, %v64_v0 }
 0x825   :  { %143 = vrot.lane.b32.xlu1 %v1286_v5, %s1057_s12 }
 0x826   :  { %v68_v6 = vpop.permute.xlu1 %67 }
 0x827   :  { %v1291_v10 = vsub.f32 %v1237_v46, %v68_v6 }
 0x829   :  { %147 = vrot.lane.b32.xlu1 %v1291_v10, %s1057_s12 }
 0x82a   :  { %v72_v22 = vpop.permute.xlu1 %71 }
 0x82b   :  { %v1299_v24 = vsub.f32 %v1244_v47, %v72_v22 }
 0x82d   :  { %149 = vrot.lane.b32.xlu1 %v1296_v11, %s1057_s12 }
 0x82e   :  { %v76_v16 = vpop.permute.xlu1 %75 }
 0x82f   :  { %v1311_v17 = vsub.f32 %v1251_v48, %v76_v16 }
 0x831   :  { %151 = vrot.lane.b32.xlu1 %v1299_v24, %s1057_s12 }
 0x835   :  { %153 = vrot.lane.b32.xlu1 %v1306_v15, %s1057_s12 }
 0x839   :  { %155 = vrot.lane.b32.xlu1 %v1311_v17, %s1057_s12 }
 0x83c   :  { %954 = vadd.xlane.f32.xlu0 %v953_v18 }
 0x83d   :  { %206 = vperm.xlu1 %1019, %v1202_v41  }
 0x841   :  { %210 = vperm.xlu1 %1019, %v1158_v27  }
 0x845   :  { %214 = vperm.xlu1 %1019, %v1209_v42  }
 0x849   :  { %218 = vperm.xlu1 %1019, %v1216_v43  }
 0x84d   :  { %226 = vperm.xlu1 %1019, %v1223_v44  }
 0x851   :  { %230 = vperm.xlu1 %1019, %v1172_v29  }
 0x852   :  { %141 = vrot.lane.b32.xlu0 %v1326_v19, %s1057_s12 }
 0x855   :  { %234 = vperm.xlu1 %1019, %v1230_v45  }
 0x856   :  { %145 = vrot.lane.b32.xlu0 %v1330_v20, %s1057_s12  ;;  %s1028_s12 = scalar_lea.vmem %s995_s11, 16 }
 0x857   :  { %p1029_p0 = scmp.ne.s32.totalorder %s995_s11, %s1028_s12  ;;  %p1034_p2 = scmp.lt.s32.totalorder %s1032_s17, %s1028_s12 }
 0x859   :  { %238 = vperm.xlu1 %1019, %v1179_v30   ;;  %p1035_p3 = por %p1034_p2, %p1033_p1 }
 0x85a   :  { %290 = vperm.xlu0 %1020, %v1202_v41  }
 0x85b   :  { %p1036_p4 = pnand %p1035_p3, %p1029_p0 }
 0x85d   :  { %242 = vperm.xlu1 %1019, %v1237_v46  }
 0x85e   :  { %294 = vperm.xlu0 %1020, %v1158_v27  }
 0x861   :  { %246 = vperm.xlu1 %1019, %v1186_v31  }
 0x862   :  { %298 = vperm.xlu0 %1020, %v1209_v42  }
 0x865   :  { %250 = vperm.xlu1 %1019, %v1244_v47  }
 0x866   :  { %306 = vperm.xlu0 %1020, %v1165_v28  }
 0x869   :  { %1021 = vset.pattern.permute.xlu1 %v1055_v3  ;;  %v1357_v3 = vpop.permute.xlu1 %131 }
 0x86a   :  { %310 = vperm.xlu0 %1020, %v1223_v44   ;;  %302 = vperm.xlu1 %1021, %v1216_v43  }
 0x86e   :  { %314 = vperm.xlu0 %1020, %v1172_v29   ;;  %322 = vperm.xlu1 %1021, %v1179_v30  }
 0x872   :  { %330 = vperm.xlu1 %1021, %v1186_v31  }
 0x876   :  { %338 = vperm.xlu1 %1021, %v1193_v32  }
 0x87a   :  { %1022 = vset.pattern.permute.xlu1 %v1054_v2 }
 0x87b   :  { %406 = vperm.xlu1 %1022, %v1202_v41  }
 0x87f   :  { %414 = vperm.xlu1 %1022, %v1209_v42  }
 0x883   :  { %418 = vperm.xlu1 %1022, %v1216_v43  }
 0x887   :  { %426 = vperm.xlu1 %1022, %v1223_v44   ;;  %v130_v38 = vpop.permute.xlu0 %129 }
 0x88b   :  { %434 = vperm.xlu1 %1022, %v1230_v45  }
 0x88f   :  { %v1360_v21 = vpop.permute.xlu1 %135  ;;  %442 = vperm.xlu1 %1022, %v1237_v46  }
 0x893   :  { %450 = vperm.xlu1 %1022, %v1244_v47   ;;  %v1364_v9 = vpop.permute.xlu1 %139 }
 0x897   :  { %458 = vperm.xlu1 %1022, %v1251_v48   ;;  %v1367_v26 = vpop.permute.xlu1 %143 }
 0x89b   :  { %1025 = vset.pattern.permute.xlu1 %v1056_v4  ;;  %v1371_v33 = vpop.permute.xlu1 %147 }
 0x89c   :  { %494 = vperm.xlu1 %1025, %v1158_v27  }
 0x89f   :  { %v1375_v34 = vpop.permute.xlu1 %149 }
 0x8a0   :  { %498 = vperm.xlu1 %1025, %v1209_v42   ;;  %v134_v42 = vpop.permute.xlu0 %133 }
 0x8a3   :  { %v1378_v35 = vpop.permute.xlu1 %151 }
 0x8a4   :  { %506 = vperm.xlu1 %1025, %v1165_v28   ;;  %v1388_v52 = vpop.permute.xlu0 %137 }
 0x8a7   :  { %v1382_v36 = vpop.permute.xlu1 %153 }
 0x8a8   :  { %514 = vperm.xlu1 %1025, %v1172_v29  }
 0x8ab   :  { %v1385_v37 = vpop.permute.xlu1 %155 }
 0x8ac   :  { %522 = vperm.xlu1 %1025, %v1179_v30  }
 0x8b0   :  { %530 = vperm.xlu1 %1025, %v1186_v31  }
 0x8b4   :  { %538 = vperm.xlu1 %1025, %v1193_v32  }
 0x8b8   :  { %1027 = vset.pattern.permute.xlu1 %v1053_v1 }
 0x8bc   :  { %v207_v40 = vpop.permute.xlu1 %206 }
 0x8c0   :  { %v211_v49 = vpop.permute.xlu1 %210 }
 0x8c4   :  { %v215_v51 = vpop.permute.xlu1 %214 }
 0x8c8   :  { %v219_v54 = vpop.permute.xlu1 %218 }
 0x8c9   :  { %v955_v58 = vpop.xlane.xlu0 %954 }
 0x8ca   :  { %v957_v59 = vmul.f32 %v956_v55, %v955_v58 }
 0x8cc   :  { %v958_v61 = vsub.f32 1.0, %v957_v59  ;;  %v227_v63 = vpop.permute.xlu1 %226 }
 0x8cd   :  { %v142_v6 = vpop.permute.xlu0 %141 }
 0x8ce   :  { %v1392_v0 = vmul.f32 %v958_v61, %v1308_v14 }
 0x8d0   :  { %v231_v7 = vpop.permute.xlu1 %230  ;;  %v961_v12 = vsel %vm960_vm4, %v1392_v0, 0.0 }
 0x8d1   :  { %v962_v23 = vsel %vm853_vm5, %v961_v12, 0.0  ;;  %v1396_v25 = vpop.permute.xlu0 %145 }
 0x8d2   :  { %963 = vadd.xlane.f32.xlu0 %v962_v23 }
 0x8d4   :  { %v235_v22 = vpop.permute.xlu1 %234 }
 0x8d8   :  { %v239_v13 = vpop.permute.xlu1 %238 }
 0x8d9   :  { %v291_v16 = vpop.permute.xlu0 %290 }
 0x8dc   :  { %v243_v39 = vpop.permute.xlu1 %242 }
 0x8dd   :  { %v295_v18 = vpop.permute.xlu0 %294 }
 0x8e0   :  { %v247_v40 = vpop.permute.xlu1 %246 }
 0x8e1   :  { %v299_v49 = vpop.permute.xlu0 %298 }
 0x8e4   :  { %v251_v51 = vpop.permute.xlu1 %250 }
 0x8e5   :  { %v307_v54 = vpop.permute.xlu0 %306 }
 0x8e8   :  { %318 = vperm.xlu0 %1020, %v1230_v45  }
 0x8e9   :  { %v303_v14 = vpop.permute.xlu1 %302  ;;  %v311_v55 = vpop.permute.xlu0 %310 }
 0x8ec   :  { %326 = vperm.xlu0 %1020, %v1237_v46  }
 0x8ed   :  { %v323_v58 = vpop.permute.xlu1 %322 }
 0x8f0   :  { %334 = vperm.xlu0 %1020, %v1244_v47  }
 0x8f1   :  { %v331_v59 = vpop.permute.xlu1 %330 }
 0x8f4   :  { %342 = vperm.xlu0 %1020, %v1251_v48  }
 0x8f8   :  { %1023 = vset.pattern.permute.xlu0 %v1054_v2  ;;  %v339_v2 = vpop.permute.xlu1 %338 }
 0x8f9   :  { %410 = vperm.xlu0 %1023, %v1158_v27   ;;  %v175_v27 = vmul.f32 %v130_v38, %v1261_v53 }
 0x8fd   :  { %422 = vperm.xlu0 %1023, %v1165_v28  }
 0x901   :  { %430 = vperm.xlu0 %1023, %v1172_v29   ;;  %v176_v29 = vmul.f32 %v1357_v3, %v1256_v50  ;;  %v315_v50 = vpop.permute.xlu0 %314 }
 0x902   :  { %v188_v50 = vmul.f32 %v1385_v37, %v1311_v17 }
 0x905   :  { %438 = vperm.xlu0 %1023, %v1179_v30  }
 0x909   :  { %446 = vperm.xlu0 %1023, %v1186_v31   ;;  %v177_v31 = vmul.f32 %v134_v42, %v1266_v56  ;;  %v185_v56 = vmul.f32 %v1375_v34, %v1296_v11 }
 0x90d   :  { %454 = vperm.xlu0 %1023, %v1193_v32  }
 0x911   :  { %1024 = vset.pattern.permute.xlu0 %v1056_v4  ;;  %v407_v4 = vpop.permute.xlu1 %406 }
 0x912   :  { %490 = vperm.xlu0 %1024, %v1202_v41  }
 0x915   :  { %v415_v30 = vpop.permute.xlu1 %414 }
 0x916   :  { %502 = vperm.xlu0 %1024, %v1216_v43   ;;  %v180_v43 = vmul.f32 %v1364_v9, %v1281_v62 }
 0x91a   :  { %510 = vperm.xlu0 %1024, %v1223_v44  }
 0x91e   :  { %518 = vperm.xlu0 %1024, %v1230_v45   ;;  %v181_v45 = vmul.f32 %v142_v6, %v1326_v19  ;;  %v186_v19 = vmul.f32 %v1378_v35, %v1299_v24 }
 0x922   :  { %526 = vperm.xlu0 %1024, %v1237_v46   ;;  %v182_v46 = vmul.f32 %v1367_v26, %v1286_v5 }
 0x926   :  { %534 = vperm.xlu0 %1024, %v1244_v47  }
 0x92a   :  { %542 = vperm.xlu0 %1024, %v1251_v48  }
 0x92e   :  { %1026 = vset.pattern.permute.xlu0 %v1053_v1  ;;  %v419_v1 = vpop.permute.xlu1 %418 }
 0x92f   :  { %222 = vperm.xlu0 %1026, %v1165_v28   ;;  %v178_v28 = vmul.f32 %v1360_v21, %v1274_v60  ;;  %v187_v21 = vmul.f32 %v1382_v36, %v1306_v15 }
 0x932   :  { %v427_v41 = vpop.permute.xlu1 %426 }
 0x933   :  { %254 = vperm.xlu0 %1026, %v1193_v32   ;;  %v179_v32 = vmul.f32 %v1388_v52, %v1271_v57  ;;  %v965_v57 = vld [vmem:[#allocation2 + $0xd] sm:$0x1]  ;;  %v183_v52 = vmul.f32 %v1396_v25, %v1330_v20 }
 0x936   :  { %v435_v44 = vpop.permute.xlu1 %434 }
 0x937   :  { %258 = vperm.xlu0 %1026, %v1251_v48   ;;  %v184_v48 = vmul.f32 %v1371_v33, %v1291_v10 }
 0x93a   :  { %v443_v47 = vpop.permute.xlu1 %442 }
 0x93b   :  { %625 = vperm.xlu0 %1026, %v175_v27  }
 0x93e   :  { %v451_v53 = vpop.permute.xlu1 %450 }
 0x93f   :  { %630 = vperm.xlu0 %1026, %v176_v29   ;;  %v983_v53 = vld [vmem:[#allocation2 + $0xf] sm:$0x1] }
 0x942   :  { %v459_v3 = vpop.permute.xlu1 %458 }
 0x943   :  { %635 = vperm.xlu0 %1026, %v177_v31  }
 0x946   :  { %v495_v33 = vpop.permute.xlu1 %494 }
 0x947   :  { %640 = vperm.xlu0 %1026, %v178_v28  }
 0x94a   :  { %v499_v38 = vpop.permute.xlu1 %498 }
 0x94b   :  { %645 = vperm.xlu0 %1026, %v179_v32   ;;  %v974_v32 = vld [vmem:[#allocation2 + $0xe] sm:$0x1] }
 0x94e   :  { %v507_v35 = vpop.permute.xlu1 %506 }
 0x94f   :  { %650 = vperm.xlu0 %1026, %v180_v43  }
 0x952   :  { %v515_v63 = vpop.permute.xlu1 %514 }
 0x953   :  { %655 = vperm.xlu0 %1026, %v181_v45  }
 0x956   :  { %v523_v15 = vpop.permute.xlu1 %522 }
 0x957   :  { %660 = vperm.xlu0 %1026, %v182_v46  }
 0x95a   :  { %v531_v7 = vpop.permute.xlu1 %530 }
 0x95b   :  { %670 = vperm.xlu0 %1026, %v184_v48  }
 0x95e   :  { %v539_v51 = vpop.permute.xlu1 %538 }
 0x95f   :  { %675 = vperm.xlu0 %1026, %v185_v56   ;;  %v964_v60 = vpop.xlane.xlu0 %963 }
 0x960   :  { %v966_v62 = vmul.f32 %v965_v57, %v964_v60 }
 0x962   :  { %v967_v5 = vsub.f32 1.0, %v966_v62 }
 0x963   :  { %680 = vperm.xlu0 %1026, %v186_v19  }
 0x964   :  { %v968_v10 = vmul.f32 %v967_v5, %v1392_v0 }
 0x966   :  { %v970_v9 = vsel %vm969_vm6, %v968_v10, 0.0 }
 0x967   :  { %685 = vperm.xlu0 %1026, %v187_v21   ;;  %v319_v11 = vpop.permute.xlu0 %318  ;;  %v971_v26 = vsel %vm853_vm5, %v970_v9, 0.0 }
 0x968   :  { %972 = vadd.xlane.f32.xlu1 %v971_v26 }
 0x96b   :  { %v327_v34 = vpop.permute.xlu0 %326 }
 0x96f   :  { %v335_v24 = vpop.permute.xlu0 %334 }
 0x973   :  { %v343_v42 = vpop.permute.xlu0 %342 }
 0x978   :  { %v411_v61 = vpop.permute.xlu0 %410 }
 0x979   :  { %665 = vperm.xlu1 %1027, %v183_v52  }
 0x97c   :  { %v423_v0 = vpop.permute.xlu0 %422 }
 0x980   :  { %v431_v36 = vpop.permute.xlu0 %430 }
 0x984   :  { %v439_v6 = vpop.permute.xlu0 %438 }
 0x988   :  { %v447_v12 = vpop.permute.xlu0 %446 }
 0x98c   :  { %v455_v23 = vpop.permute.xlu0 %454 }
 0x991   :  { %v491_v22 = vpop.permute.xlu0 %490 }
 0x995   :  { %v503_v13 = vpop.permute.xlu0 %502 }
 0x999   :  { %v511_v16 = vpop.permute.xlu0 %510 }
 0x99d   :  { %v519_v39 = vpop.permute.xlu0 %518 }
 0x9a1   :  { %v527_v18 = vpop.permute.xlu0 %526 }
 0x9a5   :  { %v535_v40 = vpop.permute.xlu0 %534 }
 0x9a9   :  { %v543_v49 = vpop.permute.xlu0 %542 }
 0x9ae   :  { %v223_v54 = vpop.permute.xlu0 %222 }
 0x9b2   :  { %v255_v20 = vpop.permute.xlu0 %254 }
 0x9b6   :  { %v259_v25 = vpop.permute.xlu0 %258 }
 0x9ba   :  { %v626_v14 = vpop.permute.xlu0 %625 }
 0x9be   :  { %v631_v55 = vpop.permute.xlu0 %630 }
 0x9c2   :  { %v636_v58 = vpop.permute.xlu0 %635 }
 0x9c6   :  { %v641_v59 = vpop.permute.xlu0 %640 }
 0x9ca   :  { %v646_v2 = vpop.permute.xlu0 %645 }
 0x9ce   :  { %v651_v4 = vpop.permute.xlu0 %650 }
 0x9d2   :  { %v656_v27 = vpop.permute.xlu0 %655 }
 0x9d6   :  { %v661_v29 = vpop.permute.xlu0 %660 }
 0x9da   :  { %v671_v30 = vpop.permute.xlu0 %670 }
 0x9de   :  { %v676_v31 = vpop.permute.xlu0 %675 }
 0x9e2   :  { %v681_v1 = vpop.permute.xlu0 %680 }
 0x9e6   :  { %v686_v28 = vpop.permute.xlu0 %685 }
 0x9f5   :  { %v973_v41 = vpop.xlane.xlu1 %972 }
 0x9f6   :  { %v975_v43 = vmul.f32 %v974_v32, %v973_v41 }
 0x9f8   :  { %v976_v44 = vsub.f32 1.0, %v975_v43 }
 0x9f9   :  { %v666_v45 = vpop.permute.xlu1 %665 }
 0x9fa   :  { %v977_v46 = vmul.f32 %v976_v44, %v968_v10 }
 0x9fc   :  { %v979_v47 = vsel %vm978_vm7, %v977_v46, 0.0 }
 0x9fd   :  { %v980_v48 = vsel %vm853_vm5, %v979_v47, 0.0 }
 0x9fe   :  { %981 = vadd.xlane.f32.xlu1 %v980_v48 }
 0xa0f   :  { %690 = vperm.xlu1 %1027, %v188_v50  }
 0xa8b   :  { %v982_v56 = vpop.xlane.xlu1 %981 }
 0xa8c   :  { %v984_v57 = vmul.f32 %v983_v53, %v982_v56 }
 0xa8e   :  { %v985_v60 = vsub.f32 1.0, %v984_v57 }
 0xa8f   :  { %v691_v62 = vpop.permute.xlu1 %690 }
 0xa90   :  { %v986_v19 = vmul.f32 %v985_v60, %v977_v46 }
 0xa92   :  { %987 = vst [vmem:[#allocation3] sm:$0x1] %v986_v19 }
 0xa93   :  { %1039 = shalt.err (!%p1036_p4)
}
 0xa94   :  { %s1040_s20 = scalar_lea.hbm %s1465_s2, 16 }
 0xa95   :  { %p1041_p5 = scmp.ne.s32.totalorder %s1465_s2, %s1040_s20  ;;  %p1044_p6 = scmp.lt.u32.totalorder %s1040_s20, %s1465_s2 }
 0xa97   :  { %p1046_p7 = pnand %p1044_p6, %p1041_p5 }
 0xa99   :  { %1049 = shalt.err (!%p1046_p7)
}
 0xa9a   :  { %997 = dma.vmem_to_hbm [thread:$0]  %s995_s11, 16, %s1465_s2, [#allocation4]  }
 0xa9b   :  { %1050 = dma.done.wait [#allocation4], 16  }
 0xa9c   :  { %1051 = vsyncadd [#allocation4], 4294967280 }
 0xa9d   :  { %1001 = vsyncpa [#allocation4], 1 }

</bundles_post_ra>
